<compile_context>
chip_gen: v7x
topology: tpu7x:2x2x1
jax: 0.10.0
libtpu: 0.0.40
codegen_flags: <defaults>
</compile_context>

<pallas_src>
import jax
import jax.numpy as jnp
from jax.experimental import pallas as pl
from jax.experimental.pallas import tpu as pltpu

_BN_EPS = 1e-5
_LANE = 128
_VMEM_LIMIT = 32 * 1024 * 1024  # safe explicit scoped-VMEM budget on v5e/v6e/v7x


def _round_up(n, m):
    return ((n + m - 1) // m) * m


def _pad2d(a, rows, cols, dtype):
    a = jnp.pad(a, ((0, rows - a.shape[0]), (0, cols - a.shape[1])))
    return a.astype(dtype)


def mlp_forward(x, params, *, batch_tile=256):
    """BYOL MLP forward. Single fused Pallas call when the batch fits one block,
    otherwise two Pallas calls with full-batch BatchNorm statistics."""
    w1t, b1, gamma, beta, w2t, b2, w3t, b3 = params
    del b1  # dead weight: training-mode BatchNorm cancels it exactly
    batch, dim = x.shape
    hidden = w1t.shape[1]
    proj = w3t.shape[1]

    dp = _round_up(dim, _LANE)
    hp = _round_up(hidden, _LANE)
    pp = _round_up(proj, _LANE)
    kmax = max(hp, pp)

    x_p = _pad2d(x, batch, dp, jnp.bfloat16)
    w1_p = _pad2d(w1t, dp, hp, jnp.bfloat16)
    w2_p = _pad2d(w2t, hp, hp, jnp.bfloat16)
    w3_p = _pad2d(w3t, hp, pp, jnp.bfloat16)

    # Pack all tiny per-feature vectors into one (4, kmax) f32 input (one DMA).
    def _row(v):
        v = v.reshape(1, -1).astype(jnp.float32)
        return jnp.pad(v, ((0, 0), (0, kmax - v.shape[1])))
    vecs = jnp.concatenate([_row(gamma), _row(beta), _row(b2), _row(b3)], axis=0)

    tb = batch if batch <= batch_tile else batch_tile
    if batch % tb:
        tb = batch  # fall back to a single full-batch block
    nb = batch // tb
    inv_n = 1.0 / float(batch)

    def _bn_relu_l2_l3(h1, vecs_v, mean, var, w2_v, w3_v):
        """Shared tail: BatchNorm (gamma folded into rsqrt) + ReLU + Linear2/3."""
        gamma_v = vecs_v[0:1, :hp]
        beta_v = vecs_v[1:2, :hp]
        b2_v = vecs_v[2:3, :hp]
        b3_v = vecs_v[3:4, :pp]
        scale = gamma_v * jax.lax.rsqrt(var + _BN_EPS)   # EUP rsqrt, gamma folded in
        h1r = jnp.maximum((h1 - mean) * scale + beta_v, 0.0)
        h2 = jnp.dot(h1r.astype(jnp.bfloat16), w2_v,
                     preferred_element_type=jnp.float32) + b2_v
        h2 = jnp.maximum(h2, 0.0)
        return jnp.dot(h2.astype(jnp.bfloat16), w3_v,
                       preferred_element_type=jnp.float32) + b3_v

    if nb == 1:
        # ---- Fused path: whole batch in one block, one kernel launch --------
        def _fused_kernel(x_ref, w1_ref, vecs_ref, w2_ref, w3_ref, o_ref):
            h1 = jnp.dot(x_ref[...], w1_ref[...],
                         preferred_element_type=jnp.float32)
            mean = jnp.sum(h1, axis=0, keepdims=True) * inv_n
            var = jnp.sum(h1 * h1, axis=0, keepdims=True) * inv_n - mean * mean
            o_ref[...] = _bn_relu_l2_l3(h1, vecs_ref[...], mean, var,
                                        w2_ref[...], w3_ref[...])

        out_p = pl.pallas_call(
            _fused_kernel,
            out_shape=jax.ShapeDtypeStruct((batch, pp), jnp.float32),
            grid_spec=pltpu.PrefetchScalarGridSpec(
                num_scalar_prefetch=0,
                grid=(1,),
                in_specs=[pl.BlockSpec((batch, dp), lambda i: (0, 0)),
                          pl.BlockSpec((dp, hp), lambda i: (0, 0)),
                          pl.BlockSpec((4, kmax), lambda i: (0, 0)),
                          pl.BlockSpec((hp, hp), lambda i: (0, 0)),
                          pl.BlockSpec((hp, pp), lambda i: (0, 0))],
                out_specs=pl.BlockSpec((batch, pp), lambda i: (0, 0))),
            compiler_params=pltpu.CompilerParams(
                dimension_semantics=("arbitrary",),
                vmem_limit_bytes=_VMEM_LIMIT),
        )(x_p, w1_p, vecs, w2_p, w3_p)
        return out_p[:, :proj]

    # ---- Phase 1: Linear1 + full-batch sum / sum-of-squares ------------------
    def _stats_kernel(x_ref, w1_ref, h1_ref, stats_ref):
        h1 = jnp.dot(x_ref[...], w1_ref[...], preferred_element_type=jnp.float32)
        h1_ref[...] = h1
        sums = jnp.concatenate(
            [jnp.sum(h1, axis=0, keepdims=True),
             jnp.sum(h1 * h1, axis=0, keepdims=True)], axis=0)

        @pl.when(pl.program_id(0) == 0)
        def _init():
            stats_ref[...] = jnp.zeros_like(stats_ref)

        stats_ref[...] += sums

    h1, stats = pl.pallas_call(
        _stats_kernel,
        out_shape=(jax.ShapeDtypeStruct((batch, hp), jnp.float32),
                   jax.ShapeDtypeStruct((2, hp), jnp.float32)),
        grid_spec=pltpu.PrefetchScalarGridSpec(
            num_scalar_prefetch=0,
            grid=(nb,),
            in_specs=[pl.BlockSpec((tb, dp), lambda i: (i, 0)),
                      pl.BlockSpec((dp, hp), lambda i: (0, 0))],
            out_specs=[pl.BlockSpec((tb, hp), lambda i: (i, 0)),
                       pl.BlockSpec((2, hp), lambda i: (0, 0))]),
        compiler_params=pltpu.CompilerParams(
            dimension_semantics=("arbitrary",),   # stats accumulator spans the grid
            vmem_limit_bytes=_VMEM_LIMIT),
    )(x_p, w1_p)

    # ---- Phase 2: BatchNorm + ReLU + Linear2/ReLU/Linear3 --------------------
    def _apply_kernel(h1_ref, stats_ref, vecs_ref, w2_ref, w3_ref, o_ref):
        stats_v = stats_ref[...]
        mean = stats_v[0:1, :] * inv_n
        var = stats_v[1:2, :] * inv_n - mean * mean     # biased batch variance
        o_ref[...] = _bn_relu_l2_l3(h1_ref[...], vecs_ref[...], mean, var,
                                    w2_ref[...], w3_ref[...])

    out_p = pl.pallas_call(
        _apply_kernel,
        out_shape=jax.ShapeDtypeStruct((batch, pp), jnp.float32),
        grid_spec=pltpu.PrefetchScalarGridSpec(
            num_scalar_prefetch=0,
            grid=(nb,),
            in_specs=[pl.BlockSpec((tb, hp), lambda i: (i, 0)),
                      pl.BlockSpec((2, hp), lambda i: (0, 0)),
                      pl.BlockSpec((4, kmax), lambda i: (0, 0)),
                      pl.BlockSpec((hp, hp), lambda i: (0, 0)),
                      pl.BlockSpec((hp, pp), lambda i: (0, 0))],
            out_specs=pl.BlockSpec((tb, pp), lambda i: (i, 0))),
        compiler_params=pltpu.CompilerParams(
            dimension_semantics=("parallel",),
            vmem_limit_bytes=_VMEM_LIMIT),
    )(h1, stats, vecs, w2_p, w3_p)

    return out_p[:, :proj]


def init_params(key, dim, projection_size, hidden_size):
    """Deterministic synthetic parameters (PyTorch-like uniform ranges)."""
    ks = jax.random.split(key, 8)

    def linear(kw, kb, fan_in, fan_out):
        bound = 1.0 / (fan_in ** 0.5)
        w = jax.random.uniform(kw, (fan_in, fan_out), jnp.float32, -bound, bound)
        b = jax.random.uniform(kb, (1, fan_out), jnp.float32, -bound, bound)
        return w, b

    w1t, b1 = linear(ks[0], ks[1], dim, hidden_size)
    w2t, b2 = linear(ks[2], ks[3], hidden_size, hidden_size)
    w3t, b3 = linear(ks[4], ks[5], hidden_size, projection_size)
    # Non-trivial BN affine params to exercise the scale/shift path.
    gamma = 1.0 + 0.1 * jax.random.normal(ks[6], (1, hidden_size), jnp.float32)
    beta = 0.1 * jax.random.normal(ks[7], (1, hidden_size), jnp.float32)
    return (w1t, b1, gamma, beta, w2t, b2, w3t, b3)


def mlp_reference(x, params, *, bf16_matmuls=True):
    """Pure-JAX reference (keeps b1, two-pass variance) for correctness checking."""
    w1t, b1, gamma, beta, w2t, b2, w3t, b3 = params
    cast = (lambda a: a.astype(jnp.bfloat16)) if bf16_matmuls else (lambda a: a)
    h1 = jnp.dot(cast(x), cast(w1t), preferred_element_type=jnp.float32) + b1
    mean = jnp.mean(h1, axis=0, keepdims=True)
    var = jnp.mean((h1 - mean) ** 2, axis=0, keepdims=True)  # biased (training mode)
    h1n = (h1 - mean) * jax.lax.rsqrt(var + _BN_EPS) * gamma + beta
    h1r = jnp.maximum(h1n, 0.0)
    h2 = jnp.maximum(
        jnp.dot(cast(h1r), cast(w2t), preferred_element_type=jnp.float32) + b2, 0.0)
    return jnp.dot(cast(h2), cast(w3t), preferred_element_type=jnp.float32) + b3


if __name__ == "__main__":
    dim, projection_size, hidden_size = 32, 32, 64
    batch = 8

    key = jax.random.PRNGKey(0)
    kx, kp = jax.random.split(key)
    x = jax.random.normal(kx, (batch, dim), jnp.float32)
    params = init_params(kp, dim, projection_size, hidden_size)

    out = jax.block_until_ready(jax.jit(mlp_forward)(x, params))
    assert out.shape == (batch, projection_size)

    # Strict check vs. a reference mirroring the kernel's bf16-operand matmul math
    # (reference keeps b1 and uses two-pass variance -> also validates that dropping
    # b1 / folding gamma is algebraically exact).
    ref_bf16 = mlp_reference(x, params, bf16_matmuls=True)
    assert jnp.allclose(out, ref_bf16, atol=5e-3, rtol=5e-3), "mismatch vs bf16 reference"

    # Loose check vs. the full-f32 PyTorch-semantics reference (bf16 rounding only).
    ref_f32 = mlp_reference(x, params, bf16_matmuls=False)
    assert jnp.allclose(out, ref_f32, atol=1e-1, rtol=0.0), "mismatch vs f32 reference"

    # Also exercise the tiled two-phase path (full-batch BN stats across tiles).
    out_tiled = jax.block_until_ready(
        jax.jit(lambda a, p: mlp_forward(a, p, batch_tile=4))(x, params))
    assert jnp.allclose(out_tiled, ref_bf16, atol=5e-3, rtol=5e-3), "tiled path mismatch"

    print("KERNEL_OK")
</pallas_src>

<mosaic_0001>
module attributes {stable_mosaic.version = 11 : i64} {
  func.func @_fused_kernel(%arg0: i32, %arg1: memref<8x128xbf16, #tpu.memory_space<vmem>>, %arg2: memref<128x128xbf16, #tpu.memory_space<vmem>>, %arg3: memref<4x128xf32, #tpu.memory_space<vmem>>, %arg4: memref<128x128xbf16, #tpu.memory_space<vmem>>, %arg5: memref<128x128xbf16, #tpu.memory_space<vmem>>, %arg6: memref<8x128xf32, #tpu.memory_space<vmem>>) attributes {dimension_semantics = [#tpu.dimension_semantics<arbitrary>], iteration_bounds = array<i64: 1>, scalar_prefetch = 0 : i64, scratch_operands = 0 : i64, tpu.core_type = #tpu.core_type<tc>, window_params = [{pipeline_mode = #tpu.pipeline_mode<synchronous>, transform_indices = @transform_0, window_bounds = array<i64: 8, 128>}, {pipeline_mode = #tpu.pipeline_mode<synchronous>, transform_indices = @transform_1, window_bounds = array<i64: 128, 128>}, {pipeline_mode = #tpu.pipeline_mode<synchronous>, transform_indices = @transform_2, window_bounds = array<i64: 4, 128>}, {pipeline_mode = #tpu.pipeline_mode<synchronous>, transform_indices = @transform_3, window_bounds = array<i64: 128, 128>}, {pipeline_mode = #tpu.pipeline_mode<synchronous>, transform_indices = @transform_4, window_bounds = array<i64: 128, 128>}, {pipeline_mode = #tpu.pipeline_mode<synchronous>, transform_indices = @transform_5, window_bounds = array<i64: 8, 128>}]} {
    %c0 = arith.constant 0 : index
    %c0_0 = arith.constant 0 : index
    %0 = vector.load %arg1[%c0, %c0_0] : memref<8x128xbf16, #tpu.memory_space<vmem>>, vector<8x128xbf16>
    %c0_1 = arith.constant 0 : index
    %c0_2 = arith.constant 0 : index
    %1 = vector.load %arg2[%c0_1, %c0_2] : memref<128x128xbf16, #tpu.memory_space<vmem>>, vector<128x128xbf16>
    %cst = arith.constant dense<0.000000e+00> : vector<8x128xf32>
    %2 = tpu.matmul %0, %1, %cst {dimension_numbers = #tpu.dot_dimension_numbers<[1], [0], [0], [1], [0, 0, 1, 1], [], []>} : vector<8x128xbf16>, vector<128x128xbf16>, vector<8x128xf32> -> vector<8x128xf32>
    %cst_3 = arith.constant dense<0.000000e+00> : vector<128xf32>
    %3 = vector.multi_reduction <add>, %2, %cst_3 [0] : vector<8x128xf32> to vector<128xf32>
    %4 = vector.shape_cast %3 : vector<128xf32> to vector<1x128xf32>
    %cst_4 = arith.constant 1.250000e-01 : f32
    %5 = vector.broadcast %cst_4 : f32 to vector<1x128xf32>
    %6 = arith.mulf %4, %5 : vector<1x128xf32>
    %7 = arith.mulf %2, %2 : vector<8x128xf32>
    %cst_5 = arith.constant dense<0.000000e+00> : vector<128xf32>
    %8 = vector.multi_reduction <add>, %7, %cst_5 [0] : vector<8x128xf32> to vector<128xf32>
    %9 = vector.shape_cast %8 : vector<128xf32> to vector<1x128xf32>
    %cst_6 = arith.constant 1.250000e-01 : f32
    %10 = vector.broadcast %cst_6 : f32 to vector<1x128xf32>
    %11 = arith.mulf %9, %10 : vector<1x128xf32>
    %12 = arith.mulf %6, %6 : vector<1x128xf32>
    %13 = arith.subf %11, %12 : vector<1x128xf32>
    %c0_7 = arith.constant 0 : index
    %c0_8 = arith.constant 0 : index
    %14 = vector.load %arg3[%c0_7, %c0_8] : memref<4x128xf32, #tpu.memory_space<vmem>>, vector<4x128xf32>
    %c0_9 = arith.constant 0 : index
    %c0_10 = arith.constant 0 : index
    %15 = vector.load %arg4[%c0_9, %c0_10] : memref<128x128xbf16, #tpu.memory_space<vmem>>, vector<128x128xbf16>
    %c0_11 = arith.constant 0 : index
    %c0_12 = arith.constant 0 : index
    %16 = vector.load %arg5[%c0_11, %c0_12] : memref<128x128xbf16, #tpu.memory_space<vmem>>, vector<128x128xbf16>
    %17 = vector.extract_strided_slice %14 {offsets = [0, 0], sizes = [1, 128], strides = [1, 1]} : vector<4x128xf32> to vector<1x128xf32>
    %18 = vector.extract_strided_slice %14 {offsets = [1, 0], sizes = [1, 128], strides = [1, 1]} : vector<4x128xf32> to vector<1x128xf32>
    %19 = vector.extract_strided_slice %14 {offsets = [2, 0], sizes = [1, 128], strides = [1, 1]} : vector<4x128xf32> to vector<1x128xf32>
    %20 = vector.extract_strided_slice %14 {offsets = [3, 0], sizes = [1, 128], strides = [1, 1]} : vector<4x128xf32> to vector<1x128xf32>
    %cst_13 = arith.constant 9.99999974E-6 : f32
    %21 = vector.broadcast %cst_13 : f32 to vector<1x128xf32>
    %22 = arith.addf %13, %21 : vector<1x128xf32>
    %23 = math.rsqrt %22 : vector<1x128xf32>
    %24 = arith.mulf %17, %23 : vector<1x128xf32>
    %25 = vector.broadcast %6 : vector<1x128xf32> to vector<8x128xf32>
    %26 = arith.subf %2, %25 : vector<8x128xf32>
    %27 = vector.broadcast %24 : vector<1x128xf32> to vector<8x128xf32>
    %28 = arith.mulf %26, %27 : vector<8x128xf32>
    %29 = vector.broadcast %18 : vector<1x128xf32> to vector<8x128xf32>
    %30 = arith.addf %28, %29 : vector<8x128xf32>
    %cst_14 = arith.constant 0.000000e+00 : f32
    %31 = vector.broadcast %cst_14 : f32 to vector<8x128xf32>
    %32 = arith.maximumf %30, %31 : vector<8x128xf32>
    %33 = arith.truncf %32 : vector<8x128xf32> to vector<8x128xbf16>
    %cst_15 = arith.constant dense<0.000000e+00> : vector<8x128xf32>
    %34 = tpu.matmul %33, %15, %cst_15 {dimension_numbers = #tpu.dot_dimension_numbers<[1], [0], [0], [1], [0, 0, 1, 1], [], []>} : vector<8x128xbf16>, vector<128x128xbf16>, vector<8x128xf32> -> vector<8x128xf32>
    %35 = vector.broadcast %19 : vector<1x128xf32> to vector<8x128xf32>
    %36 = arith.addf %34, %35 : vector<8x128xf32>
    %cst_16 = arith.constant 0.000000e+00 : f32
    %37 = vector.broadcast %cst_16 : f32 to vector<8x128xf32>
    %38 = arith.maximumf %36, %37 : vector<8x128xf32>
    %39 = arith.truncf %38 : vector<8x128xf32> to vector<8x128xbf16>
    %cst_17 = arith.constant dense<0.000000e+00> : vector<8x128xf32>
    %40 = tpu.matmul %39, %16, %cst_17 {dimension_numbers = #tpu.dot_dimension_numbers<[1], [0], [0], [1], [0, 0, 1, 1], [], []>} : vector<8x128xbf16>, vector<128x128xbf16>, vector<8x128xf32> -> vector<8x128xf32>
    %41 = vector.broadcast %20 : vector<1x128xf32> to vector<8x128xf32>
    %42 = arith.addf %40, %41 : vector<8x128xf32>
    %c0_18 = arith.constant 0 : index
    %c0_19 = arith.constant 0 : index
    %43 = vector.load %arg6[%c0_18, %c0_19] : memref<8x128xf32, #tpu.memory_space<vmem>>, vector<8x128xf32>
    tpu.vector_store %arg6[%c0_18, %c0_19], %42 {strides = array<i32>} : memref<8x128xf32, #tpu.memory_space<vmem>>, vector<8x128xf32>,
    return
  }
  func.func @transform_0(%arg0: i32) -> (i32, i32) {
    %c0_i32 = arith.constant 0 : i32
    %c0_i32_0 = arith.constant 0 : i32
    %c0_i32_1 = arith.constant 0 : i32
    return %c0_i32, %c0_i32_0 : i32, i32
  }
  func.func @transform_1(%arg0: i32) -> (i32, i32) {
    %c0_i32 = arith.constant 0 : i32
    %c0_i32_0 = arith.constant 0 : i32
    %c0_i32_1 = arith.constant 0 : i32
    return %c0_i32, %c0_i32_0 : i32, i32
  }
  func.func @transform_2(%arg0: i32) -> (i32, i32) {
    %c0_i32 = arith.constant 0 : i32
    %c0_i32_0 = arith.constant 0 : i32
    %c0_i32_1 = arith.constant 0 : i32
    return %c0_i32, %c0_i32_0 : i32, i32
  }
  func.func @transform_3(%arg0: i32) -> (i32, i32) {
    %c0_i32 = arith.constant 0 : i32
    %c0_i32_0 = arith.constant 0 : i32
    %c0_i32_1 = arith.constant 0 : i32
    return %c0_i32, %c0_i32_0 : i32, i32
  }
  func.func @transform_4(%arg0: i32) -> (i32, i32) {
    %c0_i32 = arith.constant 0 : i32
    %c0_i32_0 = arith.constant 0 : i32
    %c0_i32_1 = arith.constant 0 : i32
    return %c0_i32, %c0_i32_0 : i32, i32
  }
  func.func @transform_5(%arg0: i32) -> (i32, i32) {
    %c0_i32 = arith.constant 0 : i32
    %c0_i32_0 = arith.constant 0 : i32
    %c0_i32_1 = arith.constant 0 : i32
    return %c0_i32, %c0_i32_0 : i32, i32
  }
}

</mosaic_0001>

<bundles_post_ra>
// kernel: mlp_forward.1
= control target key start
LH: loop header
LB: loop body
LE: loop exit
PB: predicated region body
PF: predicated region fallthrough
CT: control target
= control target key end

     0   :  { %v558_v1 = vmov 0.0   ;;  %vm559_vm0 = vmmov 0   ;;  %s711_s0 = inlined_call_operand.vmem [shape: bf16[8,128], index: 0, kind: input, shape index: {}]   ;;  %s712_s1 = inlined_call_operand.vmem [shape: bf16[128,128], index: 1, kind: input, shape index: {}]   ;;  %s713_s2 = inlined_call_operand.vmem [shape: f32[4,128], index: 2, kind: input, shape index: {}]   ;;  %s714_s3 = inlined_call_operand.vmem [shape: bf16[128,128], index: 3, kind: input, shape index: {}]   ;;  %s715_s4 = inlined_call_operand.vmem [shape: bf16[128,128], index: 4, kind: input, shape index: {}]   ;;  %s716_s5 = inlined_call_operand.hbm [shape: f32[8,128], index: 5, kind: output, shape index: {}]  }
   0x1   :  { %v508_v0 = vld [vmem:[%s712_s1] sm:$0xff]   ;;  %445 = vmatprep.subr.bf16.mxu0 %v558_v1  ;;  %465 = vmatprep.subr.bf16.mxu1 %v558_v1  ;;  %v509_v2 = vld [vmem:[%s712_s1 + $0x8] sm:$0xff]   ;;  %v510_v3 = vld [vmem:[%s712_s1 + $0x10] sm:$0xff]  }
   0x2   :  { %446 = vmatpush3.bf16.msra.mxu0 %v508_v0  ;;  %461 = vmatprep.mubr.msk.bf16.mxu0 %vm559_vm0, %v558_v1  ;;  %v511_v4 = vld [vmem:[%s712_s1 + $0x18] sm:$0xff]   ;;  %v512_v5 = vld [vmem:[%s712_s1 + $0x20] sm:$0xff]   ;;  %v513_v6 = vld [vmem:[%s712_s1 + $0x28] sm:$0xff]  }
   0x3   :  { %447 = vmatprep.subr.bf16.mxu0 %v558_v1  ;;  %481 = vmatprep.mubr.msk.bf16.mxu1 %vm559_vm0, %v558_v1 }
   0x6   :  { %448 = vmatpush3.bf16.msra.mxu0 %v509_v2 }
   0x7   :  { %449 = vmatprep.subr.bf16.mxu0 %v558_v1 }
   0xa   :  { %450 = vmatpush3.bf16.msra.mxu0 %v510_v3 }
   0xb   :  { %451 = vmatprep.subr.bf16.mxu0 %v558_v1 }
   0xe   :  { %452 = vmatpush3.bf16.msra.mxu0 %v511_v4 }
   0xf   :  { %453 = vmatprep.subr.bf16.mxu0 %v558_v1 }
  0x12   :  { %454 = vmatpush3.bf16.msra.mxu0 %v512_v5 }
  0x13   :  { %455 = vmatprep.subr.bf16.mxu0 %v558_v1 }
  0x14   :  { %10 = vsyncpa [#allocation3], 0  ;;  %v514_v7 = vld [vmem:[%s712_s1 + $0x30] sm:$0xff]   ;;  %v515_v8 = vld [vmem:[%s712_s1 + $0x38] sm:$0xff]   ;;  %v181_v46 = vlaneseq  ;;  %s560_s14 = smov [#allocation2]  }
  0x15   :  { %v22_v9 = vld [vmem:[%s711_s0] sm:$0xf]  ;;  %v517_v11 = vld [vmem:[%s714_s3 + $0x8] sm:$0xff]   ;;  %v518_v12 = vld [vmem:[%s714_s3 + $0x10] sm:$0xff]   ;;  %s386_s15 = sshll.u32 %s560_s14, 4  ;;  %s387_s15 = int_to_ptr.vmem [resolvable:$true] %s386_s15 }
  0x16   :  { %456 = vmatpush3.bf16.msra.mxu0 %v513_v6  ;;  %v516_v10 = vld [vmem:[%s714_s3] sm:$0xff]   ;;  %v519_v13 = vld [vmem:[%s714_s3 + $0x18] sm:$0xff]   ;;  %v521_v15 = vld [vmem:[%s714_s3 + $0x28] sm:$0xff]   ;;  %v182_v47 = vshrl.u32 %v181_v46, 7  ;;  %p539_p1 = scmp.lt.s32.totalorder %s387_s15, %s387_s15 }
  0x17   :  { %457 = vmatprep.subr.bf16.mxu0 %v558_v1  ;;  %466 = vmatpush3.bf16.msra.mxu1 %v516_v10  ;;  %v520_v14 = vld [vmem:[%s714_s3 + $0x20] sm:$0xff]   ;;  %v522_v16 = vld [vmem:[%s714_s3 + $0x30] sm:$0xff]   ;;  %v523_v17 = vld [vmem:[%s714_s3 + $0x38] sm:$0xff]  }
  0x18   :  { %467 = vmatprep.subr.bf16.mxu1 %v558_v1  ;;  %v524_v18 = vld [vmem:[%s715_s4] sm:$0xff]   ;;  %v525_v19 = vld [vmem:[%s715_s4 + $0x8] sm:$0xff]   ;;  %v526_v20 = vld [vmem:[%s715_s4 + $0x10] sm:$0xff]   ;;  %v183_v49 = vsub.s32 0, %v182_v47  ;;  %v188_v50 = vsub.s32 1, %v182_v47  ;;  %v195_v62 = vsub.s32 2, %v182_v47 }
  0x19   :  { %v527_v21 = vld [vmem:[%s715_s4 + $0x18] sm:$0xff]   ;;  %v528_v22 = vld [vmem:[%s715_s4 + $0x20] sm:$0xff]   ;;  %v529_v23 = vld [vmem:[%s715_s4 + $0x28] sm:$0xff]  }
  0x1a   :  { %458 = vmatpush3.bf16.msra.mxu0 %v514_v7  ;;  %v144_v48 = vld [vmem:[%s713_s2] sm:$0xf]  ;;  %v530_v60 = vld [vmem:[%s715_s4 + $0x30] sm:$0xff]   ;;  %v531_v61 = vld [vmem:[%s715_s4 + $0x38] sm:$0xff]   ;;  %s534_s4 = scalar_lea.vmem %s387_s15, 128 }
  0x1b   :  { %459 = vmatprep.subr.bf16.mxu0 %v558_v1  ;;  %468 = vmatpush3.bf16.msra.mxu1 %v517_v11  ;;  %v189_v55 = vrot.slane %v144_v48, %v188_v50  ;;  %v196_v63 = vrot.slane %v144_v48, %v195_v62  ;;  %p535_p0 = scmp.ne.s32.totalorder %s387_s15, %s534_s4  ;;  %p540_p2 = scmp.lt.s32.totalorder %s534_s4, %s534_s4 }
  0x1c   :  { %469 = vmatprep.subr.bf16.mxu1 %v558_v1 }
  0x1d   :  { %p541_p3 = por %p540_p2, %p539_p1 }
  0x1e   :  { %460 = vmatpush3.bf16.msra.mxu0 %v515_v8  ;;  %v289_v8 = vsub.s32 3, %v182_v47 }
  0x1f   :  { %485 = vmatprep.subr.bf16.mxu0 %v558_v1  ;;  %470 = vmatpush3.bf16.msra.mxu1 %v518_v12  ;;  %p542_p4 = pnand %p541_p3, %p535_p0 }
  0x20   :  { %471 = vmatprep.subr.bf16.mxu1 %v558_v1 }
  0x21   :  { %462 = vmatmul.mubr.bf16.vlgmr.msra.gmra.mrb[0].mxu0 %v22_v9  ;;  %v290_v9 = vrot.slane %v144_v48, %v289_v8 }
  0x22   :  { %501 = vmatprep.mubr.msk.bf16.mxu0 %vm559_vm0, %v558_v1  ;;  %486 = vmatpush3.bf16.msra.mxu0 %v524_v18 }
  0x23   :  { %472 = vmatpush3.bf16.msra.mxu1 %v519_v13  ;;  %487 = vmatprep.subr.bf16.mxu0 %v558_v1 }
  0x24   :  { %473 = vmatprep.subr.bf16.mxu1 %v558_v1 }
  0x26   :  { %488 = vmatpush3.bf16.msra.mxu0 %v525_v19 }
  0x27   :  { %474 = vmatpush3.bf16.msra.mxu1 %v520_v14  ;;  %489 = vmatprep.subr.bf16.mxu0 %v558_v1 }
  0x28   :  { %475 = vmatprep.subr.bf16.mxu1 %v558_v1 }
  0x2a   :  { %490 = vmatpush3.bf16.msra.mxu0 %v526_v20 }
  0x2b   :  { %476 = vmatpush3.bf16.msra.mxu1 %v521_v15  ;;  %491 = vmatprep.subr.bf16.mxu0 %v558_v1 }
  0x2c   :  { %477 = vmatprep.subr.bf16.mxu1 %v558_v1 }
  0x2e   :  { %492 = vmatpush3.bf16.msra.mxu0 %v527_v21 }
  0x2f   :  { %478 = vmatpush3.bf16.msra.mxu1 %v522_v16  ;;  %493 = vmatprep.subr.bf16.mxu0 %v558_v1 }
  0x30   :  { %479 = vmatprep.subr.bf16.mxu1 %v558_v1 }
  0x32   :  { %494 = vmatpush3.bf16.msra.mxu0 %v528_v22 }
  0x33   :  { %480 = vmatpush3.bf16.msra.mxu1 %v523_v17  ;;  %495 = vmatprep.subr.bf16.mxu0 %v558_v1 }
  0x36   :  { %496 = vmatpush3.bf16.msra.mxu0 %v529_v23 }
  0x37   :  { %497 = vmatprep.subr.bf16.mxu0 %v558_v1 }
  0x3a   :  { %498 = vmatpush3.bf16.msra.mxu0 %v530_v60 }
  0x3b   :  { %499 = vmatprep.subr.bf16.mxu0 %v558_v1 }
  0x3e   :  { %500 = vmatpush3.bf16.msra.mxu0 %v531_v61 }
  0xf4   :  { %v121_v24 = vpop.f32.mrb[0].mxu0 }
  0xf5   :  { %v127_v25 = vrot.slane %v121_v24, 4  ;;  %v134_v26 = vmul.f32 %v121_v24, %v121_v24  ;;  %v463_v27 = vpop.f32.mrb[1].mxu0 }
  0xf6   :  { %v124_v28 = vpop.f32.mrb[2].mxu0 }
  0xf7   :  { %v128_v29 = vadd.f32 %v127_v25, %v121_v24  ;;  %v135_v30 = vrot.slane %v134_v26, 4  ;;  %v464_v31 = vpop.f32.mrb[3].mxu0 }
  0xf9   :  { %v129_v32 = vrot.slane %v128_v29, 2  ;;  %v136_v33 = vadd.f32 %v135_v30, %v134_v26 }
  0xfb   :  { %v130_v34 = vadd.f32 %v129_v32, %v128_v29  ;;  %v137_v35 = vrot.slane %v136_v33, 2 }
  0xfd   :  { %v131_v36 = vrot.slane %v130_v34, 1  ;;  %v138_v37 = vadd.f32 %v137_v35, %v136_v33 }
  0xff   :  { %v132_v38 = vadd.f32 %v131_v36, %v130_v34  ;;  %v139_v39 = vrot.slane %v138_v37, 1 }
 0x101   :  { %v133_v40 = vmul.f32 0.125, %v132_v38  ;;  %v140_v41 = vadd.f32 %v139_v39, %v138_v37 }
 0x103   :  { %v141_v42 = vmul.f32 0.125, %v140_v41  ;;  %v142_v43 = vmul.f32 %v133_v40, %v133_v40  ;;  %v180_v53 = vsub.f32 %v121_v24, %v133_v40 }
 0x105   :  { %v143_v44 = vsub.f32 %v141_v42, %v142_v43 }
 0x107   :  { %v177_v45 = vadd.f32 1e-05, %v143_v44 }
 0x109   :  { %532 = vrsqrt.f32 %v177_v45 }
 0x113   :  { %v533_v51 = vpop.eup %532 }
 0x114   :  { %v179_v52 = vmul.f32 %v533_v51, %v144_v48 }
 0x116   :  { %v184_v54 = vrot.slane %v179_v52, %v183_v49 }
 0x118   :  { %v185_v56 = vmul.f32 %v184_v54, %v180_v53 }
 0x11a   :  { %v190_v57 = vadd.f32 %v189_v55, %v185_v56 }
 0x11c   :  { %v191_v58 = vmax.f32 %v190_v57, 0.0 }
 0x11e   :  { %v192_v59 = vpack.c.bf16 %v191_v58, %v191_v58 }
 0x120   :  { %482 = vmatmul.mubr.bf16.vlgmr.msra.gmra.mrb[0].mxu1 %v192_v59 }
 0x1f3   :  { %v279_v0 = vpop.f32.mrb[0].mxu1 }
 0x1f4   :  { %v280_v2 = vadd.f32 %v279_v0, %v196_v63  ;;  %v483_v3 = vpop.f32.mrb[1].mxu1 }
 0x1f5   :  { %v282_v4 = vpop.f32.mrb[2].mxu1 }
 0x1f6   :  { %v285_v5 = vmax.f32 %v280_v2, 0.0  ;;  %v484_v6 = vpop.f32.mrb[3].mxu1 }
 0x1f8   :  { %v286_v7 = vpack.c.bf16 %v285_v5, %v285_v5 }
 0x1fa   :  { %502 = vmatmul.mubr.bf16.vlgmr.msra.gmra.mrb[4].mxu0 %v286_v7 }
 0x2cd   :  { %v373_v1 = vpop.f32.mrb[4].mxu0 }
 0x2ce   :  { %v374_v10 = vadd.f32 %v373_v1, %v290_v9  ;;  %v503_v11 = vpop.f32.mrb[5].mxu0 }
 0x2cf   :  { %v376_v12 = vpop.f32.mrb[6].mxu0 }
 0x2d0   :  { %379 = vst [vmem:[#allocation2] sm:$0xff] %v374_v10  ;;  %v504_v13 = vpop.f32.mrb[7].mxu0 }
 0x2d1   :  { %545 = shalt.err (!%p542_p4)
}
 0x2d2   :  { %s546_s18 = scalar_lea.hbm %s716_s5, 128 }
 0x2d3   :  { %p547_p5 = scmp.ne.s32.totalorder %s716_s5, %s546_s18  ;;  %p550_p6 = scmp.lt.u32.totalorder %s546_s18, %s716_s5 }
 0x2d5   :  { %p552_p7 = pnand %p550_p6, %p547_p5 }
 0x2d7   :  { %555 = shalt.err (!%p552_p7)
}
 0x2d8   :  { %389 = dma.vmem_to_hbm [thread:$0]  %s387_s15, 128, %s716_s5, [#allocation3]  }
 0x2d9   :  { %556 = dma.done.wait [#allocation3], 128  }
 0x2da   :  { %557 = vsyncadd [#allocation3], 4294967168 }
 0x2db   :  { %393 = vsyncpa [#allocation3], 1 }

</bundles_post_ra>
